<compile_context>
chip_gen: v7x
topology: tpu7x:2x2x1
jax: 0.10.0
libtpu: 0.0.40
codegen_flags: <defaults>
</compile_context>

<pallas_src>
import functools

import jax
import jax.numpy as jnp
from jax.experimental import pallas as pl
from jax.experimental.pallas import tpu as pltpu


def _pixlevel_kernel(params_ref,          # SMEM (25,) f32: w1_eff(12), b1(6), w2(6), b2(1)
                     x_ref, w_ref,        # VMEM: (TB, C, HWp), (2C, C)
                     y_ref,               # VMEM: (TB, C, HWp)
                     *, C, TB):
    w = w_ref[...]                        # stacked [w_avg; w_max]  (2C, C)

    # Static unrolled loop over the TB batch elements in this block.
    for b in range(TB):
        xb = x_ref[b]                     # (C, HWp)

        # Fused 1x1 convs: ONE MXU matmul feeds both the avg and max branches.
        z = jnp.dot(w, xb, preferred_element_type=jnp.float32)    # (2C, HWp)
        z = jnp.maximum(z, 0.0)

        # avg branch: mean over channels (sublanes), then global spatial max.
        # Padded lanes are exactly 0 and ReLU outputs are >= 0, so padding can
        # never change the global max.
        avg_map = jnp.mean(z[:C, :], axis=0, keepdims=True)       # (1, HWp)
        avg_p = jnp.max(avg_map, axis=1, keepdims=True)           # (1, 1)

        # max branch: reduce lanes first (smaller intermediate), then sublanes.
        max_c = jnp.max(z[C:, :], axis=1, keepdims=True)          # (C, 1)
        max_p = jnp.max(max_c, axis=0, keepdims=True)             # (1, 1)

        # Bottleneck MLP (Linear(3->6)+ReLU+Linear(6->1)); the third input
        # (out_p = avg_p + max_p) is already folded into w1_eff host-side.
        s = jnp.zeros((1, 1), jnp.float32) + params_ref[24]       # b2
        for j in range(6):
            h = (params_ref[12 + j]                               # b1[j]
                 + params_ref[2 * j] * avg_p                      # w1_eff[j,0]
                 + params_ref[2 * j + 1] * max_p)                 # w1_eff[j,1]
            h = jnp.maximum(h, 0.0)
            s = s + params_ref[18 + j] * h                        # w2[j]

        # y = scale * x   (broadcast (1,1) over (C, HWp))
        y_ref[b] = (s * xb.astype(jnp.float32)).astype(y_ref.dtype)


def pixlevel_forward(x, w_avg, w_max, w1, b1, w2, b2, *, compute_dtype=None):
    """x: (B, C, H, W). Returns (B, C, H, W) with the same dtype as x.

    compute_dtype: optionally jnp.bfloat16 to halve HBM traffic on v6e/v7x
    (matmul still accumulates in f32); default keeps the module's f32 semantics.
    """
    B, C, H, W = x.shape
    HW = H * W
    out_dtype = x.dtype
    cdt = jnp.dtype(compute_dtype) if compute_dtype is not None else jnp.dtype(x.dtype)

    # ---- host-side (trace-time) parameter preprocessing --------------------
    # Fuse the two 1x1 convs into a single stacked weight.
    w_stacked = jnp.concatenate([w_avg, w_max], axis=0).astype(cdt)        # (2C, C)

    # Fold the third bottleneck input (out_p = avg_p + max_p) into w1.
    w1_eff = jnp.stack([w1[:, 0] + w1[:, 2], w1[:, 1] + w1[:, 2]], axis=1)  # (6, 2)
    params = jnp.concatenate([
        w1_eff.reshape(-1), b1.reshape(-1), w2.reshape(-1), b2.reshape(-1),
    ]).astype(jnp.float32)                                                 # (25,)

    # ---- layout: (B, C, HW) with lane-dense (multiple-of-128) HW ------------
    HWp = pl.cdiv(HW, 128) * 128
    x2 = x.reshape(B, C, HW).astype(cdt)
    if HWp != HW:
        # Zero padding is safe: ReLU outputs are >= 0, so extra zero lanes can
        # never change the global max; padded output lanes are sliced off.
        x2 = jnp.pad(x2, ((0, 0), (0, 0), (0, HWp - HW)))

    # ---- pick a batch tile TB from a conservative VMEM budget ---------------
    itemsize = jnp.dtype(cdt).itemsize
    per_b_bytes = C * HWp * itemsize
    vmem_budget = 24 * 1024 * 1024          # safe on v5e/v6e (128 MiB) and v7x (64 MiB)
    TB = int(max(1, min(B, 8, vmem_budget // (8 * per_b_bytes))))
    # TODO(synk): for very large C*HW (one batch element exceeding the budget) a
    # two-pass HW-tiled variant (reduce pass + scale pass) would be needed.

    Bp = pl.cdiv(B, TB) * TB
    if Bp != B:
        # Padded batch elements compute a garbage scale on an all-zero tile
        # (0 * garbage = 0) and are sliced off below.
        x2 = jnp.pad(x2, ((0, Bp - B), (0, 0), (0, 0)))

    # Explicit VMEM limit sized to the actual per-step footprint (+headroom).
    block_in = TB * C * HWp * itemsize
    block_w = 2 * C * C * itemsize
    z_bytes = TB * 2 * C * HWp * 4          # f32 matmul/relu intermediates
    vmem_needed = 2 * (2 * block_in) + 2 * block_w + z_bytes
    vmem_limit = int(min(max(2 * vmem_needed, 16 * 1024 * 1024), 48 * 1024 * 1024))

    kernel = functools.partial(_pixlevel_kernel, C=C, TB=TB)
    smem = pl.BlockSpec(memory_space=pltpu.MemorySpace.SMEM)

    y2 = pl.pallas_call(
        kernel,
        out_shape=jax.ShapeDtypeStruct((Bp, C, HWp), cdt),
        grid=(Bp // TB,),
        in_specs=[
            smem,                                               # packed bottleneck params
            pl.BlockSpec((TB, C, HWp), lambda i: (i, 0, 0)),    # x
            pl.BlockSpec((2 * C, C), lambda i: (0, 0)),         # stacked conv weights
        ],
        out_specs=pl.BlockSpec((TB, C, HWp), lambda i: (i, 0, 0)),
        compiler_params=pltpu.CompilerParams(
            dimension_semantics=("parallel",),
            vmem_limit_bytes=vmem_limit),
    )(params, x2, w_stacked)

    return y2[:B, :, :HW].reshape(B, C, H, W).astype(out_dtype)


def pixlevel_reference(x, w_avg, w_max, w1, b1, w2, b2):
    """Pure-JAX reference of the PyTorch forward (high-precision matmuls)."""
    hi = jax.lax.Precision.HIGHEST
    xa = jnp.maximum(jnp.einsum('oc,bchw->bohw', w_avg, x, precision=hi), 0.0)
    xm = jnp.maximum(jnp.einsum('oc,bchw->bohw', w_max, x, precision=hi), 0.0)
    avg = jnp.mean(xa, axis=1)                 # (B, H, W)
    mx = jnp.max(xm, axis=1)                   # (B, H, W)
    avg_p = jnp.max(avg, axis=(1, 2))          # (B,)
    max_p = jnp.max(mx, axis=(1, 2))           # (B,)
    out_p = avg_p + max_p                      # (B,)  (max-pool of a 1x1 map)
    vec = jnp.stack([avg_p, max_p, out_p], -1) # (B, 3)
    h = jnp.maximum(vec @ w1.T + b1, 0.0)      # (B, 6)
    s = h @ w2 + b2[0]                         # (B,)
    return s[:, None, None, None] * x


def _make_inputs(key, B, C, H, W):
    kx, ka, km, k1, kb1, k2, kb2 = jax.random.split(key, 7)
    x = jax.random.normal(kx, (B, C, H, W), jnp.float32)
    w_avg = jax.random.normal(ka, (C, C), jnp.float32) * 0.3   # Conv2d(C,C,1,bias=False)
    w_max = jax.random.normal(km, (C, C), jnp.float32) * 0.3
    w1 = jax.random.normal(k1, (6, 3), jnp.float32) * 0.4       # Linear(3, 6)
    b1 = jax.random.normal(kb1, (6,), jnp.float32) * 0.1
    w2 = jax.random.normal(k2, (6,), jnp.float32) * 0.4         # Linear(6, 1) weight row
    b2 = jax.random.normal(kb2, (1,), jnp.float32) * 0.1
    return x, w_avg, w_max, w1, b1, w2, b2


if __name__ == "__main__":
    key = jax.random.PRNGKey(0)
    k_a, k_b = jax.random.split(key)

    # Primary demo shape (lane-aligned spatial: HW = 256).
    args = _make_inputs(k_a, B=2, C=4, H=16, W=16)
    y = jax.block_until_ready(pixlevel_forward(*args))
    y_ref = pixlevel_reference(*args)
    assert y.shape == (2, 4, 16, 16)
    assert jnp.allclose(y, y_ref, atol=2e-3, rtol=2e-3), "mismatch vs reference (aligned)"

    # Secondary shape exercising HW padding (HW=100 -> 128), odd batch and
    # batch padding (B=3 with TB=3).
    args2 = _make_inputs(k_b, B=3, C=4, H=10, W=10)
    y2 = jax.block_until_ready(pixlevel_forward(*args2))
    y2_ref = pixlevel_reference(*args2)
    assert y2.shape == (3, 4, 10, 10)
    assert jnp.allclose(y2, y2_ref, atol=2e-3, rtol=2e-3), "mismatch vs reference (padded)"

    print("KERNEL_OK")
</pallas_src>

<mosaic_0001>
module attributes {stable_mosaic.version = 11 : i64} {
  func.func @_pixlevel_kernel(%arg0: i32, %arg1: memref<25xf32, #tpu.memory_space<smem>>, %arg2: memref<2x4x256xf32, #tpu.memory_space<vmem>>, %arg3: memref<8x4xf32, #tpu.memory_space<vmem>>, %arg4: memref<2x4x256xf32, #tpu.memory_space<vmem>>) attributes {dimension_semantics = [#tpu.dimension_semantics<parallel>], iteration_bounds = array<i64: 1>, scalar_prefetch = 0 : i64, scratch_operands = 0 : i64, tpu.core_type = #tpu.core_type<tc>, window_params = [{transform_indices = @transform_0, window_bounds = array<i64: 25>}, {transform_indices = @transform_1, window_bounds = array<i64: 2, 4, 256>}, {pipeline_mode = #tpu.pipeline_mode<synchronous>, transform_indices = @transform_2, window_bounds = array<i64: 8, 4>}, {transform_indices = @transform_3, window_bounds = array<i64: 2, 4, 256>}]} {
    %c0 = arith.constant 0 : index
    %c0_0 = arith.constant 0 : index
    %0 = vector.load %arg3[%c0, %c0_0] : memref<8x4xf32, #tpu.memory_space<vmem>>, vector<8x4xf32>
    %c0_1 = arith.constant 0 : index
    %c0_2 = arith.constant 0 : index
    %c0_3 = arith.constant 0 : index
    %1 = vector.load %arg2[%c0_1, %c0_2, %c0_3] : memref<2x4x256xf32, #tpu.memory_space<vmem>>, vector<1x4x256xf32>
    %2 = vector.shape_cast %1 : vector<1x4x256xf32> to vector<4x256xf32>
    %cst = arith.constant dense<0.000000e+00> : vector<8x256xf32>
    %3 = tpu.matmul %0, %2, %cst {dimension_numbers = #tpu.dot_dimension_numbers<[1], [0], [0], [1], [0, 0, 1, 1], [], []>} : vector<8x4xf32>, vector<4x256xf32>, vector<8x256xf32> -> vector<8x256xf32>
    %cst_4 = arith.constant 0.000000e+00 : f32
    %4 = vector.broadcast %cst_4 : f32 to vector<8x256xf32>
    %5 = arith.maximumf %3, %4 : vector<8x256xf32>
    %6 = vector.extract_strided_slice %5 {offsets = [0, 0], sizes = [4, 256], strides = [1, 1]} : vector<8x256xf32> to vector<4x256xf32>
    %cst_5 = arith.constant dense<0.000000e+00> : vector<256xf32>
    %7 = vector.multi_reduction <add>, %6, %cst_5 [0] : vector<4x256xf32> to vector<256xf32>
    %8 = vector.shape_cast %7 : vector<256xf32> to vector<1x256xf32>
    %cst_6 = arith.constant 4.000000e+00 : f32
    %9 = vector.broadcast %cst_6 : f32 to vector<1x256xf32>
    %10 = arith.divf %8, %9 : vector<1x256xf32>
    %cst_7 = arith.constant dense<0xFF800000> : vector<1xf32>
    %11 = vector.multi_reduction <maximumf>, %10, %cst_7 [1] : vector<1x256xf32> to vector<1xf32>
    %12 = vector.shape_cast %11 : vector<1xf32> to vector<1x1xf32>
    %13 = vector.extract_strided_slice %5 {offsets = [4, 0], sizes = [4, 256], strides = [1, 1]} : vector<8x256xf32> to vector<4x256xf32>
    %cst_8 = arith.constant dense<0xFF800000> : vector<4xf32>
    %14 = vector.multi_reduction <maximumf>, %13, %cst_8 [1] : vector<4x256xf32> to vector<4xf32>
    %15 = vector.shape_cast %14 : vector<4xf32> to vector<4x1xf32>
    %cst_9 = arith.constant dense<0xFF800000> : vector<1xf32>
    %16 = vector.multi_reduction <maximumf>, %15, %cst_9 [0] : vector<4x1xf32> to vector<1xf32>
    %17 = vector.shape_cast %16 : vector<1xf32> to vector<1x1xf32>
    %cst_10 = arith.constant 0.000000e+00 : f32
    %18 = vector.broadcast %cst_10 : f32 to vector<1x1xf32>
    %c24 = arith.constant 24 : index
    %19 = memref.load %arg1[%c24] : memref<25xf32, #tpu.memory_space<smem>>
    %20 = vector.broadcast %19 : f32 to vector<1x1xf32>
    %21 = arith.addf %18, %20 : vector<1x1xf32>
    %c12 = arith.constant 12 : index
    %22 = memref.load %arg1[%c12] : memref<25xf32, #tpu.memory_space<smem>>
    %c0_11 = arith.constant 0 : index
    %23 = memref.load %arg1[%c0_11] : memref<25xf32, #tpu.memory_space<smem>>
    %24 = vector.broadcast %23 : f32 to vector<1x1xf32>
    %25 = arith.mulf %24, %12 : vector<1x1xf32>
    %26 = vector.broadcast %22 : f32 to vector<1x1xf32>
    %27 = arith.addf %26, %25 : vector<1x1xf32>
    %c1 = arith.constant 1 : index
    %28 = memref.load %arg1[%c1] : memref<25xf32, #tpu.memory_space<smem>>
    %29 = vector.broadcast %28 : f32 to vector<1x1xf32>
    %30 = arith.mulf %29, %17 : vector<1x1xf32>
    %31 = arith.addf %27, %30 : vector<1x1xf32>
    %cst_12 = arith.constant 0.000000e+00 : f32
    %32 = vector.broadcast %cst_12 : f32 to vector<1x1xf32>
    %33 = arith.maximumf %31, %32 : vector<1x1xf32>
    %c18 = arith.constant 18 : index
    %34 = memref.load %arg1[%c18] : memref<25xf32, #tpu.memory_space<smem>>
    %35 = vector.broadcast %34 : f32 to vector<1x1xf32>
    %36 = arith.mulf %35, %33 : vector<1x1xf32>
    %37 = arith.addf %21, %36 : vector<1x1xf32>
    %c13 = arith.constant 13 : index
    %38 = memref.load %arg1[%c13] : memref<25xf32, #tpu.memory_space<smem>>
    %c2 = arith.constant 2 : index
    %39 = memref.load %arg1[%c2] : memref<25xf32, #tpu.memory_space<smem>>
    %40 = vector.broadcast %39 : f32 to vector<1x1xf32>
    %41 = arith.mulf %40, %12 : vector<1x1xf32>
    %42 = vector.broadcast %38 : f32 to vector<1x1xf32>
    %43 = arith.addf %42, %41 : vector<1x1xf32>
    %c3 = arith.constant 3 : index
    %44 = memref.load %arg1[%c3] : memref<25xf32, #tpu.memory_space<smem>>
    %45 = vector.broadcast %44 : f32 to vector<1x1xf32>
    %46 = arith.mulf %45, %17 : vector<1x1xf32>
    %47 = arith.addf %43, %46 : vector<1x1xf32>
    %cst_13 = arith.constant 0.000000e+00 : f32
    %48 = vector.broadcast %cst_13 : f32 to vector<1x1xf32>
    %49 = arith.maximumf %47, %48 : vector<1x1xf32>
    %c19 = arith.constant 19 : index
    %50 = memref.load %arg1[%c19] : memref<25xf32, #tpu.memory_space<smem>>
    %51 = vector.broadcast %50 : f32 to vector<1x1xf32>
    %52 = arith.mulf %51, %49 : vector<1x1xf32>
    %53 = arith.addf %37, %52 : vector<1x1xf32>
    %c14 = arith.constant 14 : index
    %54 = memref.load %arg1[%c14] : memref<25xf32, #tpu.memory_space<smem>>
    %c4 = arith.constant 4 : index
    %55 = memref.load %arg1[%c4] : memref<25xf32, #tpu.memory_space<smem>>
    %56 = vector.broadcast %55 : f32 to vector<1x1xf32>
    %57 = arith.mulf %56, %12 : vector<1x1xf32>
    %58 = vector.broadcast %54 : f32 to vector<1x1xf32>
    %59 = arith.addf %58, %57 : vector<1x1xf32>
    %c5 = arith.constant 5 : index
    %60 = memref.load %arg1[%c5] : memref<25xf32, #tpu.memory_space<smem>>
    %61 = vector.broadcast %60 : f32 to vector<1x1xf32>
    %62 = arith.mulf %61, %17 : vector<1x1xf32>
    %63 = arith.addf %59, %62 : vector<1x1xf32>
    %cst_14 = arith.constant 0.000000e+00 : f32
    %64 = vector.broadcast %cst_14 : f32 to vector<1x1xf32>
    %65 = arith.maximumf %63, %64 : vector<1x1xf32>
    %c20 = arith.constant 20 : index
    %66 = memref.load %arg1[%c20] : memref<25xf32, #tpu.memory_space<smem>>
    %67 = vector.broadcast %66 : f32 to vector<1x1xf32>
    %68 = arith.mulf %67, %65 : vector<1x1xf32>
    %69 = arith.addf %53, %68 : vector<1x1xf32>
    %c15 = arith.constant 15 : index
    %70 = memref.load %arg1[%c15] : memref<25xf32, #tpu.memory_space<smem>>
    %c6 = arith.constant 6 : index
    %71 = memref.load %arg1[%c6] : memref<25xf32, #tpu.memory_space<smem>>
    %72 = vector.broadcast %71 : f32 to vector<1x1xf32>
    %73 = arith.mulf %72, %12 : vector<1x1xf32>
    %74 = vector.broadcast %70 : f32 to vector<1x1xf32>
    %75 = arith.addf %74, %73 : vector<1x1xf32>
    %c7 = arith.constant 7 : index
    %76 = memref.load %arg1[%c7] : memref<25xf32, #tpu.memory_space<smem>>
    %77 = vector.broadcast %76 : f32 to vector<1x1xf32>
    %78 = arith.mulf %77, %17 : vector<1x1xf32>
    %79 = arith.addf %75, %78 : vector<1x1xf32>
    %cst_15 = arith.constant 0.000000e+00 : f32
    %80 = vector.broadcast %cst_15 : f32 to vector<1x1xf32>
    %81 = arith.maximumf %79, %80 : vector<1x1xf32>
    %c21 = arith.constant 21 : index
    %82 = memref.load %arg1[%c21] : memref<25xf32, #tpu.memory_space<smem>>
    %83 = vector.broadcast %82 : f32 to vector<1x1xf32>
    %84 = arith.mulf %83, %81 : vector<1x1xf32>
    %85 = arith.addf %69, %84 : vector<1x1xf32>
    %c16 = arith.constant 16 : index
    %86 = memref.load %arg1[%c16] : memref<25xf32, #tpu.memory_space<smem>>
    %c8 = arith.constant 8 : index
    %87 = memref.load %arg1[%c8] : memref<25xf32, #tpu.memory_space<smem>>
    %88 = vector.broadcast %87 : f32 to vector<1x1xf32>
    %89 = arith.mulf %88, %12 : vector<1x1xf32>
    %90 = vector.broadcast %86 : f32 to vector<1x1xf32>
    %91 = arith.addf %90, %89 : vector<1x1xf32>
    %c9 = arith.constant 9 : index
    %92 = memref.load %arg1[%c9] : memref<25xf32, #tpu.memory_space<smem>>
    %93 = vector.broadcast %92 : f32 to vector<1x1xf32>
    %94 = arith.mulf %93, %17 : vector<1x1xf32>
    %95 = arith.addf %91, %94 : vector<1x1xf32>
    %cst_16 = arith.constant 0.000000e+00 : f32
    %96 = vector.broadcast %cst_16 : f32 to vector<1x1xf32>
    %97 = arith.maximumf %95, %96 : vector<1x1xf32>
    %c22 = arith.constant 22 : index
    %98 = memref.load %arg1[%c22] : memref<25xf32, #tpu.memory_space<smem>>
    %99 = vector.broadcast %98 : f32 to vector<1x1xf32>
    %100 = arith.mulf %99, %97 : vector<1x1xf32>
    %101 = arith.addf %85, %100 : vector<1x1xf32>
    %c17 = arith.constant 17 : index
    %102 = memref.load %arg1[%c17] : memref<25xf32, #tpu.memory_space<smem>>
    %c10 = arith.constant 10 : index
    %103 = memref.load %arg1[%c10] : memref<25xf32, #tpu.memory_space<smem>>
    %104 = vector.broadcast %103 : f32 to vector<1x1xf32>
    %105 = arith.mulf %104, %12 : vector<1x1xf32>
    %106 = vector.broadcast %102 : f32 to vector<1x1xf32>
    %107 = arith.addf %106, %105 : vector<1x1xf32>
    %c11 = arith.constant 11 : index
    %108 = memref.load %arg1[%c11] : memref<25xf32, #tpu.memory_space<smem>>
    %109 = vector.broadcast %108 : f32 to vector<1x1xf32>
    %110 = arith.mulf %109, %17 : vector<1x1xf32>
    %111 = arith.addf %107, %110 : vector<1x1xf32>
    %cst_17 = arith.constant 0.000000e+00 : f32
    %112 = vector.broadcast %cst_17 : f32 to vector<1x1xf32>
    %113 = arith.maximumf %111, %112 : vector<1x1xf32>
    %c23 = arith.constant 23 : index
    %114 = memref.load %arg1[%c23] : memref<25xf32, #tpu.memory_space<smem>>
    %115 = vector.broadcast %114 : f32 to vector<1x1xf32>
    %116 = arith.mulf %115, %113 : vector<1x1xf32>
    %117 = arith.addf %101, %116 : vector<1x1xf32>
    %118 = vector.broadcast %117 : vector<1x1xf32> to vector<4x256xf32>
    %119 = arith.mulf %118, %2 : vector<4x256xf32>
    %c0_18 = arith.constant 0 : index
    %c0_19 = arith.constant 0 : index
    %c0_20 = arith.constant 0 : index
    %120 = vector.load %arg4[%c0_18, %c0_19, %c0_20] : memref<2x4x256xf32, #tpu.memory_space<vmem>>, vector<1x4x256xf32>
    %121 = vector.shape_cast %120 : vector<1x4x256xf32> to vector<4x256xf32>
    %122 = vector.shape_cast %119 : vector<4x256xf32> to vector<1x4x256xf32>
    tpu.vector_store %arg4[%c0_18, %c0_19, %c0_20], %122 {strides = array<i32>} : memref<2x4x256xf32, #tpu.memory_space<vmem>>, vector<1x4x256xf32>,
    %c1_21 = arith.constant 1 : index
    %c0_22 = arith.constant 0 : index
    %c0_23 = arith.constant 0 : index
    %123 = vector.load %arg2[%c1_21, %c0_22, %c0_23] : memref<2x4x256xf32, #tpu.memory_space<vmem>>, vector<1x4x256xf32>
    %124 = vector.shape_cast %123 : vector<1x4x256xf32> to vector<4x256xf32>
    %cst_24 = arith.constant dense<0.000000e+00> : vector<8x256xf32>
    %125 = tpu.matmul %0, %124, %cst_24 {dimension_numbers = #tpu.dot_dimension_numbers<[1], [0], [0], [1], [0, 0, 1, 1], [], []>} : vector<8x4xf32>, vector<4x256xf32>, vector<8x256xf32> -> vector<8x256xf32>
    %cst_25 = arith.constant 0.000000e+00 : f32
    %126 = vector.broadcast %cst_25 : f32 to vector<8x256xf32>
    %127 = arith.maximumf %125, %126 : vector<8x256xf32>
    %128 = vector.extract_strided_slice %127 {offsets = [0, 0], sizes = [4, 256], strides = [1, 1]} : vector<8x256xf32> to vector<4x256xf32>
    %cst_26 = arith.constant dense<0.000000e+00> : vector<256xf32>
    %129 = vector.multi_reduction <add>, %128, %cst_26 [0] : vector<4x256xf32> to vector<256xf32>
    %130 = vector.shape_cast %129 : vector<256xf32> to vector<1x256xf32>
    %cst_27 = arith.constant 4.000000e+00 : f32
    %131 = vector.broadcast %cst_27 : f32 to vector<1x256xf32>
    %132 = arith.divf %130, %131 : vector<1x256xf32>
    %cst_28 = arith.constant dense<0xFF800000> : vector<1xf32>
    %133 = vector.multi_reduction <maximumf>, %132, %cst_28 [1] : vector<1x256xf32> to vector<1xf32>
    %134 = vector.shape_cast %133 : vector<1xf32> to vector<1x1xf32>
    %135 = vector.extract_strided_slice %127 {offsets = [4, 0], sizes = [4, 256], strides = [1, 1]} : vector<8x256xf32> to vector<4x256xf32>
    %cst_29 = arith.constant dense<0xFF800000> : vector<4xf32>
    %136 = vector.multi_reduction <maximumf>, %135, %cst_29 [1] : vector<4x256xf32> to vector<4xf32>
    %137 = vector.shape_cast %136 : vector<4xf32> to vector<4x1xf32>
    %cst_30 = arith.constant dense<0xFF800000> : vector<1xf32>
    %138 = vector.multi_reduction <maximumf>, %137, %cst_30 [0] : vector<4x1xf32> to vector<1xf32>
    %139 = vector.shape_cast %138 : vector<1xf32> to vector<1x1xf32>
    %cst_31 = arith.constant 0.000000e+00 : f32
    %140 = vector.broadcast %cst_31 : f32 to vector<1x1xf32>
    %c24_32 = arith.constant 24 : index
    %141 = memref.load %arg1[%c24_32] : memref<25xf32, #tpu.memory_space<smem>>
    %142 = vector.broadcast %141 : f32 to vector<1x1xf32>
    %143 = arith.addf %140, %142 : vector<1x1xf32>
    %c12_33 = arith.constant 12 : index
    %144 = memref.load %arg1[%c12_33] : memref<25xf32, #tpu.memory_space<smem>>
    %c0_34 = arith.constant 0 : index
    %145 = memref.load %arg1[%c0_34] : memref<25xf32, #tpu.memory_space<smem>>
    %146 = vector.broadcast %145 : f32 to vector<1x1xf32>
    %147 = arith.mulf %146, %134 : vector<1x1xf32>
    %148 = vector.broadcast %144 : f32 to vector<1x1xf32>
    %149 = arith.addf %148, %147 : vector<1x1xf32>
    %c1_35 = arith.constant 1 : index
    %150 = memref.load %arg1[%c1_35] : memref<25xf32, #tpu.memory_space<smem>>
    %151 = vector.broadcast %150 : f32 to vector<1x1xf32>
    %152 = arith.mulf %151, %139 : vector<1x1xf32>
    %153 = arith.addf %149, %152 : vector<1x1xf32>
    %cst_36 = arith.constant 0.000000e+00 : f32
    %154 = vector.broadcast %cst_36 : f32 to vector<1x1xf32>
    %155 = arith.maximumf %153, %154 : vector<1x1xf32>
    %c18_37 = arith.constant 18 : index
    %156 = memref.load %arg1[%c18_37] : memref<25xf32, #tpu.memory_space<smem>>
    %157 = vector.broadcast %156 : f32 to vector<1x1xf32>
    %158 = arith.mulf %157, %155 : vector<1x1xf32>
    %159 = arith.addf %143, %158 : vector<1x1xf32>
    %c13_38 = arith.constant 13 : index
    %160 = memref.load %arg1[%c13_38] : memref<25xf32, #tpu.memory_space<smem>>
    %c2_39 = arith.constant 2 : index
    %161 = memref.load %arg1[%c2_39] : memref<25xf32, #tpu.memory_space<smem>>
    %162 = vector.broadcast %161 : f32 to vector<1x1xf32>
    %163 = arith.mulf %162, %134 : vector<1x1xf32>
    %164 = vector.broadcast %160 : f32 to vector<1x1xf32>
    %165 = arith.addf %164, %163 : vector<1x1xf32>
    %c3_40 = arith.constant 3 : index
    %166 = memref.load %arg1[%c3_40] : memref<25xf32, #tpu.memory_space<smem>>
    %167 = vector.broadcast %166 : f32 to vector<1x1xf32>
    %168 = arith.mulf %167, %139 : vector<1x1xf32>
    %169 = arith.addf %165, %168 : vector<1x1xf32>
    %cst_41 = arith.constant 0.000000e+00 : f32
    %170 = vector.broadcast %cst_41 : f32 to vector<1x1xf32>
    %171 = arith.maximumf %169, %170 : vector<1x1xf32>
    %c19_42 = arith.constant 19 : index
    %172 = memref.load %arg1[%c19_42] : memref<25xf32, #tpu.memory_space<smem>>
    %173 = vector.broadcast %172 : f32 to vector<1x1xf32>
    %174 = arith.mulf %173, %171 : vector<1x1xf32>
    %175 = arith.addf %159, %174 : vector<1x1xf32>
    %c14_43 = arith.constant 14 : index
    %176 = memref.load %arg1[%c14_43] : memref<25xf32, #tpu.memory_space<smem>>
    %c4_44 = arith.constant 4 : index
    %177 = memref.load %arg1[%c4_44] : memref<25xf32, #tpu.memory_space<smem>>
    %178 = vector.broadcast %177 : f32 to vector<1x1xf32>
    %179 = arith.mulf %178, %134 : vector<1x1xf32>
    %180 = vector.broadcast %176 : f32 to vector<1x1xf32>
    %181 = arith.addf %180, %179 : vector<1x1xf32>
    %c5_45 = arith.constant 5 : index
    %182 = memref.load %arg1[%c5_45] : memref<25xf32, #tpu.memory_space<smem>>
    %183 = vector.broadcast %182 : f32 to vector<1x1xf32>
    %184 = arith.mulf %183, %139 : vector<1x1xf32>
    %185 = arith.addf %181, %184 : vector<1x1xf32>
    %cst_46 = arith.constant 0.000000e+00 : f32
    %186 = vector.broadcast %cst_46 : f32 to vector<1x1xf32>
    %187 = arith.maximumf %185, %186 : vector<1x1xf32>
    %c20_47 = arith.constant 20 : index
    %188 = memref.load %arg1[%c20_47] : memref<25xf32, #tpu.memory_space<smem>>
    %189 = vector.broadcast %188 : f32 to vector<1x1xf32>
    %190 = arith.mulf %189, %187 : vector<1x1xf32>
    %191 = arith.addf %175, %190 : vector<1x1xf32>
    %c15_48 = arith.constant 15 : index
    %192 = memref.load %arg1[%c15_48] : memref<25xf32, #tpu.memory_space<smem>>
    %c6_49 = arith.constant 6 : index
    %193 = memref.load %arg1[%c6_49] : memref<25xf32, #tpu.memory_space<smem>>
    %194 = vector.broadcast %193 : f32 to vector<1x1xf32>
    %195 = arith.mulf %194, %134 : vector<1x1xf32>
    %196 = vector.broadcast %192 : f32 to vector<1x1xf32>
    %197 = arith.addf %196, %195 : vector<1x1xf32>
    %c7_50 = arith.constant 7 : index
    %198 = memref.load %arg1[%c7_50] : memref<25xf32, #tpu.memory_space<smem>>
    %199 = vector.broadcast %198 : f32 to vector<1x1xf32>
    %200 = arith.mulf %199, %139 : vector<1x1xf32>
    %201 = arith.addf %197, %200 : vector<1x1xf32>
    %cst_51 = arith.constant 0.000000e+00 : f32
    %202 = vector.broadcast %cst_51 : f32 to vector<1x1xf32>
    %203 = arith.maximumf %201, %202 : vector<1x1xf32>
    %c21_52 = arith.constant 21 : index
    %204 = memref.load %arg1[%c21_52] : memref<25xf32, #tpu.memory_space<smem>>
    %205 = vector.broadcast %204 : f32 to vector<1x1xf32>
    %206 = arith.mulf %205, %203 : vector<1x1xf32>
    %207 = arith.addf %191, %206 : vector<1x1xf32>
    %c16_53 = arith.constant 16 : index
    %208 = memref.load %arg1[%c16_53] : memref<25xf32, #tpu.memory_space<smem>>
    %c8_54 = arith.constant 8 : index
    %209 = memref.load %arg1[%c8_54] : memref<25xf32, #tpu.memory_space<smem>>
    %210 = vector.broadcast %209 : f32 to vector<1x1xf32>
    %211 = arith.mulf %210, %134 : vector<1x1xf32>
    %212 = vector.broadcast %208 : f32 to vector<1x1xf32>
    %213 = arith.addf %212, %211 : vector<1x1xf32>
    %c9_55 = arith.constant 9 : index
    %214 = memref.load %arg1[%c9_55] : memref<25xf32, #tpu.memory_space<smem>>
    %215 = vector.broadcast %214 : f32 to vector<1x1xf32>
    %216 = arith.mulf %215, %139 : vector<1x1xf32>
    %217 = arith.addf %213, %216 : vector<1x1xf32>
    %cst_56 = arith.constant 0.000000e+00 : f32
    %218 = vector.broadcast %cst_56 : f32 to vector<1x1xf32>
    %219 = arith.maximumf %217, %218 : vector<1x1xf32>
    %c22_57 = arith.constant 22 : index
    %220 = memref.load %arg1[%c22_57] : memref<25xf32, #tpu.memory_space<smem>>
    %221 = vector.broadcast %220 : f32 to vector<1x1xf32>
    %222 = arith.mulf %221, %219 : vector<1x1xf32>
    %223 = arith.addf %207, %222 : vector<1x1xf32>
    %c17_58 = arith.constant 17 : index
    %224 = memref.load %arg1[%c17_58] : memref<25xf32, #tpu.memory_space<smem>>
    %c10_59 = arith.constant 10 : index
    %225 = memref.load %arg1[%c10_59] : memref<25xf32, #tpu.memory_space<smem>>
    %226 = vector.broadcast %225 : f32 to vector<1x1xf32>
    %227 = arith.mulf %226, %134 : vector<1x1xf32>
    %228 = vector.broadcast %224 : f32 to vector<1x1xf32>
    %229 = arith.addf %228, %227 : vector<1x1xf32>
    %c11_60 = arith.constant 11 : index
    %230 = memref.load %arg1[%c11_60] : memref<25xf32, #tpu.memory_space<smem>>
    %231 = vector.broadcast %230 : f32 to vector<1x1xf32>
    %232 = arith.mulf %231, %139 : vector<1x1xf32>
    %233 = arith.addf %229, %232 : vector<1x1xf32>
    %cst_61 = arith.constant 0.000000e+00 : f32
    %234 = vector.broadcast %cst_61 : f32 to vector<1x1xf32>
    %235 = arith.maximumf %233, %234 : vector<1x1xf32>
    %c23_62 = arith.constant 23 : index
    %236 = memref.load %arg1[%c23_62] : memref<25xf32, #tpu.memory_space<smem>>
    %237 = vector.broadcast %236 : f32 to vector<1x1xf32>
    %238 = arith.mulf %237, %235 : vector<1x1xf32>
    %239 = arith.addf %223, %238 : vector<1x1xf32>
    %240 = vector.broadcast %239 : vector<1x1xf32> to vector<4x256xf32>
    %241 = arith.mulf %240, %124 : vector<4x256xf32>
    %c1_63 = arith.constant 1 : index
    %c0_64 = arith.constant 0 : index
    %c0_65 = arith.constant 0 : index
    %242 = vector.load %arg4[%c1_63, %c0_64, %c0_65] : memref<2x4x256xf32, #tpu.memory_space<vmem>>, vector<1x4x256xf32>
    %243 = vector.shape_cast %242 : vector<1x4x256xf32> to vector<4x256xf32>
    %244 = vector.shape_cast %241 : vector<4x256xf32> to vector<1x4x256xf32>
    tpu.vector_store %arg4[%c1_63, %c0_64, %c0_65], %244 {strides = array<i32>} : memref<2x4x256xf32, #tpu.memory_space<vmem>>, vector<1x4x256xf32>,
    return
  }
  func.func @transform_0(%arg0: i32) -> i32 {
    %c0_i32 = arith.constant 0 : i32
    %c0_i32_0 = arith.constant 0 : i32
    return %c0_i32 : i32
  }
  func.func @transform_1(%arg0: i32) -> (i32, i32, i32) {
    %c0_i32 = arith.constant 0 : i32
    %c0_i32_0 = arith.constant 0 : i32
    %c0_i32_1 = arith.constant 0 : i32
    return %arg0, %c0_i32, %c0_i32_0 : i32, i32, i32
  }
  func.func @transform_2(%arg0: i32) -> (i32, i32) {
    %c0_i32 = arith.constant 0 : i32
    %c0_i32_0 = arith.constant 0 : i32
    %c0_i32_1 = arith.constant 0 : i32
    return %c0_i32, %c0_i32_0 : i32, i32
  }
  func.func @transform_3(%arg0: i32) -> (i32, i32, i32) {
    %c0_i32 = arith.constant 0 : i32
    %c0_i32_0 = arith.constant 0 : i32
    %c0_i32_1 = arith.constant 0 : i32
    return %arg0, %c0_i32, %c0_i32_0 : i32, i32, i32
  }
}

</mosaic_0001>

<bundles_post_ra>
// kernel: tpu_custom_call.1
= control target key start
LH: loop header
LB: loop body
LE: loop exit
PB: predicated region body
PF: predicated region fallthrough
CT: control target
= control target key end

     0   :  { %8 = vsyncpa [#allocation5], 0  ;;  %s809_s0 = inlined_call_operand.vmem [shape: f32[25], index: 0, kind: input, shape index: {}]   ;;  %s810_s1 = inlined_call_operand.hbm [shape: f32[2,4,256], index: 1, kind: input, shape index: {}]   ;;  %s811_s2 = inlined_call_operand.vmem [shape: f32[8,4], index: 2, kind: input, shape index: {}]   ;;  %s812_s3 = inlined_call_operand.hbm [shape: f32[2,4,256], index: 3, kind: output, shape index: {}]  }
   0x1   :  { %9 = vsyncpa [#allocation3], 0 }
   0x2   :  { %10 = vsyncpa [#allocation4], 0  ;;  %s17_s14 = sshll.u32 %s809_s0, 4  ;;  %s18_s14 = int_to_ptr.vmem [resolvable:$true] %s17_s14 }
   0x3   :  { %s544_s15 = scalar_lea.vmem %s18_s14, 16  ;;  %p549_p1 = scmp.lt.s32.totalorder %s18_s14, %s18_s14 }
   0x4   :  { %p545_p0 = scmp.ne.s32.totalorder %s18_s14, %s544_s15  ;;  %p550_p2 = scmp.lt.s32.totalorder %s544_s15, %s544_s15 }
   0x6   :  { %p551_p3 = por %p550_p2, %p549_p1 }
   0x8   :  { %p552_p4 = pnand %p551_p3, %p545_p0 }
   0xa   :  { %555 = shalt.err (!%p552_p4)
}
   0xb   :  { %s606_s16 = smov [#allocation2]   ;;  %s607_s17 = smov [#allocation6]  }
   0xc   :  { %20 = dma.vmem_to_smem %s18_s14, 16, %s606_s16, [#allocation5]  }
   0xd   :  { %s26_s18 = sshll.u32 %s607_s17, 4  ;;  %s556_s21 = scalar_lea.hbm %s810_s1, 256  ;;  %s27_s18 = int_to_ptr.vmem [resolvable:$true] %s26_s18 }
   0xe   :  { %p557_p5 = scmp.ne.s32.totalorder %s810_s1, %s556_s21  ;;  %p560_p6 = scmp.lt.u32.totalorder %s556_s21, %s810_s1 }
  0x10   :  { %p562_p7 = pnand %p560_p6, %p557_p5 }
  0x12   :  { %565 = shalt.err (!%p562_p7)
}
  0x13   :  { %s566_s25 = scalar_lea.vmem %s27_s18, 256  ;;  %p571_p9 = scmp.lt.s32.totalorder %s27_s18, %s27_s18 }
  0x14   :  { %p567_p8 = scmp.ne.s32.totalorder %s27_s18, %s566_s25  ;;  %p572_p10 = scmp.lt.s32.totalorder %s566_s25, %s566_s25 }
  0x16   :  { %p573_p11 = por %p572_p10, %p571_p9 }
  0x18   :  { %p574_p12 = pnand %p573_p11, %p567_p8 }
  0x1a   :  { %577 = shalt.err (!%p574_p12)
}
  0x1b   :  { %s608_s26 = smov 128   ;;  %s609_s27 = smov 8  }
  0x1c   :  { %32 = dma.hbm_to_vmem [thread:$0]  %s810_s1, 256, %s27_s18, [#allocation3], %s608_s26, %s608_s26, %s609_s27  }
  0x1d   :  { %600 = dma.done.wait [#allocation5], 16  }
  0x1e   :  { %601 = vsyncadd [#allocation5], 4294967280 }
  0x1f   :  { %602 = dma.done.wait [#allocation3], 256  }
  0x20   :  { %603 = vsyncadd [#allocation3], 4294967040 }
  0x21   :  { %41 = sfence }
  0x22   :  { %v650_v0 = vld [vmem:[#allocation6] sm:$0xff]  ;;  %vm50_vm0 = vcmask 1043456   ;;  %v652_v1 = vld [vmem:[#allocation6 + $0x8] sm:$0xff]  ;;  %v610_v4 = vmov 0.0   ;;  %vm46_vm1 = vcmask 31744   ;;  %vm148_vm2 = vcmask 1047556  }
  0x23   :  { %v45_v2 = vcombine.high %v650_v0, %v650_v0  ;;  %v259_v3 = vcombine.high %v652_v1, %v652_v1  ;;  %119 = vmatprep.mubr.f32.mxu0 %v610_v4  ;;  %328 = vmatprep.mubr.f32.mxu1 %v610_v4  ;;  %v42_v5 = vld [vmem:[%s811_s2] sm:$0xff]  ;;  %s675_s2 = sld [smem:[#allocation2 + $0x1]]  ;;  %s677_s4 = sld [smem:[#allocation2]] }
  0x24   :  { %s679_s5 = sld [smem:[#allocation2 + $0x3]]  ;;  %s681_s6 = sld [smem:[#allocation2 + $0x2]] }
  0x25   :  { %482 = vmatprep.subr.msk.mxu0 %vm50_vm0, %v45_v2  ;;  %509 = vmatprep.subr.msk.mxu1 %vm50_vm0, %v259_v3  ;;  %s683_s7 = sld [smem:[#allocation2 + $0x4]]  ;;  %s687_s9 = sld [smem:[#allocation2 + $0x6]] }
  0x26   :  { %483 = vmatpush1.msk.msra.mxu0 %vm50_vm0, %v650_v0  ;;  %510 = vmatpush1.msk.msra.mxu1 %vm50_vm0, %v652_v1  ;;  %s685_s8 = sld [smem:[#allocation2 + $0xc]]  ;;  %s689_s10 = sld [smem:[#allocation2 + $0xd]] }
  0x27   :  { %484 = vmatmul.mubr.msk.f32.vlgmr.msra.gmra.mrb[0].mxu0 %vm46_vm1, %v42_v5  ;;  %511 = vmatmul.mubr.msk.f32.vlgmr.msra.gmra.mrb[0].mxu1 %vm46_vm1, %v42_v5  ;;  %s691_s11 = sld [smem:[#allocation2 + $0xe]]  ;;  %s693_s12 = sld [smem:[#allocation2 + $0xf]] }
  0x28   :  { %s695_s13 = sld [smem:[#allocation2 + $0x8]]  ;;  %s697_s14 = sld [smem:[#allocation2 + $0xa]] }
  0x29   :  { %s699_s15 = sld [smem:[#allocation2 + $0x5]]  ;;  %s702_s16 = sld [smem:[#allocation2 + $0x7]]  ;;  %v171_v62 = vstv %s675_s2  ;;  %v166_v63 = vstv %s677_s4 }
  0x2a   :  { %s704_s17 = sld [smem:[#allocation2 + $0x10]]  ;;  %s706_s18 = sld [smem:[#allocation2 + $0x11]]  ;;  %v181_v2 = vstv %s681_s6  ;;  %v186_v3 = vstv %s679_s5 }
  0x2b   :  { %s708_s19 = sld [smem:[#allocation2 + $0x9]]  ;;  %s710_s20 = sld [smem:[#allocation2 + $0x12]]  ;;  %v196_v4 = vstv %s683_s7 }
  0x2c   :  { %s712_s21 = sld [smem:[#allocation2 + $0x13]]  ;;  %s714_s22 = sld [smem:[#allocation2 + $0x18]] }
  0x2d   :  { %s716_s23 = sld [smem:[#allocation2 + $0xb]]  ;;  %s719_s0 = sld [smem:[#allocation2 + $0x14]] }
  0x2e   :  { %s721_s24 = sld [smem:[#allocation2 + $0x15]]  ;;  %s724_s25 = sld [smem:[#allocation2 + $0x16]] }
  0x2f   :  { %s757_s28 = sld [smem:[#allocation2 + $0x17]]  ;;  %s611_s29 = smov [#allocation7]  }
  0x30   :  { %s469_s1 = sshll.u32 %s611_s29, 4  ;;  %s470_s1 = int_to_ptr.vmem [resolvable:$true] %s469_s1 }
  0x31   :  { %s578_s30 = scalar_lea.vmem %s470_s1, 256  ;;  %p583_p0 = scmp.lt.s32.totalorder %s470_s1, %s470_s1 }
  0x32   :  { %p579_p13 = scmp.ne.s32.totalorder %s470_s1, %s578_s30  ;;  %p584_p1 = scmp.lt.s32.totalorder %s578_s30, %s578_s30 }
  0x34   :  { %p585_p2 = por %p584_p1, %p583_p0 }
  0x36   :  { %p586_p3 = pnand %p585_p2, %p579_p13 }
  0xfa   :  { %v121_v6 = vpop.f32.mrb[0].mxu0  ;;  %v330_v7 = vpop.f32.mrb[0].mxu1 }
  0xfb   :  { %v126_v8 = vmax.f32 %v121_v6, 0.0  ;;  %v335_v9 = vmax.f32 %v330_v7, 0.0  ;;  %v123_v10 = vpop.f32.mrb[1].mxu0  ;;  %v332_v11 = vpop.f32.mrb[1].mxu1  ;;  %v168_v7 = vstv %s685_s8 }
  0xfc   :  { %v127_v12 = vmax.f32 %v123_v10, 0.0  ;;  %v336_v13 = vmax.f32 %v332_v11, 0.0  ;;  %v198_v10 = vstv %s691_s11  ;;  %v213_v11 = vstv %s693_s12 }
  0xfd   :  { %v128_v14 = vsel %vm50_vm0, %v126_v8, 0.0  ;;  %v337_v15 = vsel %vm50_vm0, %v335_v9, 0.0  ;;  %v149_v16 = vsel %vm148_vm2, %v126_v8, -inf  ;;  %v356_v17 = vsel %vm148_vm2, %v335_v9, -inf }
  0xfe   :  { %v129_v18 = vrot.slane %v128_v14, 4  ;;  %v338_v19 = vrot.slane %v337_v15, 4  ;;  %v135_v20 = vsel %vm50_vm0, %v127_v12, 0.0  ;;  %v344_v21 = vsel %vm50_vm0, %v336_v13, 0.0 }
  0xff   :  { %v136_v22 = vrot.slane %v135_v20, 4  ;;  %v345_v23 = vrot.slane %v344_v21, 4  ;;  %v357_v24 = vsel %vm148_vm2, %v336_v13, -inf  ;;  %v150_v25 = vsel %vm148_vm2, %v127_v12, -inf }
 0x100   :  { %v130_v26 = vadd.f32 %v129_v18, %v128_v14  ;;  %v339_v27 = vadd.f32 %v338_v19, %v337_v15  ;;  %v151_v28 = vmax.f32 %v149_v16, %v150_v25  ;;  %v358_v29 = vmax.f32 %v356_v17, %v357_v24 }
 0x101   :  { %v137_v30 = vadd.f32 %v136_v22, %v135_v20  ;;  %v346_v31 = vadd.f32 %v345_v23, %v344_v21  ;;  %v211_v8 = vstv %s687_s9  ;;  %v183_v9 = vstv %s689_s10 }
 0x102   :  { %v131_v32 = vrot.slane %v130_v26, 2  ;;  %v340_v33 = vrot.slane %v339_v27, 2  ;;  %152 = vmax.xlane.f32.xlu0 %v151_v28  ;;  %v226_v12 = vstv %s695_s13  ;;  %v241_v15 = vstv %s697_s14 }
 0x103   :  { %v138_v34 = vrot.slane %v137_v30, 2  ;;  %v347_v35 = vrot.slane %v346_v31, 2  ;;  %v408_v16 = vstv %s699_s15  ;;  %v423_v17 = vstv %s702_s16 }
 0x104   :  { %v341_v36 = vadd.f32 %v340_v33, %v339_v27  ;;  %v132_v37 = vadd.f32 %v131_v32, %v130_v26  ;;  %v435_v18 = vstv %s704_s17  ;;  %v450_v19 = vstv %s706_s18 }
 0x105   :  { %v348_v38 = vadd.f32 %v347_v35, %v346_v31  ;;  %v139_v39 = vadd.f32 %v138_v34, %v137_v30  ;;  %v231_v20 = vstv %s708_s19  ;;  %v383_v23 = vstv %s710_s20 }
 0x106   :  { %359 = vmax.xlane.f32.xlu0 %v358_v29  ;;  %v133_v40 = vrot.slane %v132_v37, 1  ;;  %v342_v41 = vrot.slane %v341_v36, 1  ;;  %v191_v24 = vstv %s712_s21  ;;  %v162_v26 = vstv %s714_s22 }
 0x107   :  { %v140_v42 = vrot.slane %v139_v39, 1  ;;  %v349_v43 = vrot.slane %v348_v38, 1  ;;  %v206_v27 = vstv %s719_s0  ;;  %v221_v28 = vstv %s721_s24 }
 0x108   :  { %v134_v44 = vadd.f32 %v133_v40, %v132_v37  ;;  %v343_v45 = vadd.f32 %v342_v41, %v341_v36  ;;  %v246_v29 = vstv %s716_s23  ;;  %v236_v33 = vstv %s724_s25 }
 0x109   :  { %v141_v46 = vadd.f32 %v140_v42, %v139_v39  ;;  %v350_v47 = vadd.f32 %v349_v43, %v348_v38 }
 0x10a   :  { %v143_v48 = vmul.f32 0.25, %v134_v44  ;;  %v351_v49 = vmul.f32 0.25, %v343_v45 }
 0x10b   :  { %v144_v50 = vmul.f32 0.25, %v141_v46  ;;  %v352_v51 = vmul.f32 0.25, %v350_v47 }
 0x10d   :  { %v145_v52 = vmax.f32 %v143_v48, %v144_v50  ;;  %v353_v53 = vmax.f32 %v351_v49, %v352_v51 }
 0x10f   :  { %146 = vmax.xlane.f32.xlu1 %v145_v52 }
 0x113   :  { %354 = vmax.xlane.f32.xlu1 %v353_v53 }
 0x18f   :  { %v153_v54 = vpop.xlane.xlu0 %152 }
 0x190   :  { %v154_v55 = vsel %vm148_vm2, %v153_v54, -inf }
 0x191   :  { %v155_v56 = vrot.slane %v154_v55, 4 }
 0x193   :  { %v156_v57 = vmax.f32 %v154_v55, %v155_v56  ;;  %v360_v58 = vpop.xlane.xlu0 %359 }
 0x194   :  { %v361_v59 = vsel %vm148_vm2, %v360_v58, -inf }
 0x195   :  { %v157_v60 = vrot.slane %v156_v57, 2  ;;  %v362_v61 = vrot.slane %v361_v59, 4 }
 0x197   :  { %v158_v5 = vmax.f32 %v156_v57, %v157_v60  ;;  %v363_v6 = vmax.f32 %v361_v59, %v362_v61 }
 0x199   :  { %v159_v13 = vrot.slane %v158_v5, 1  ;;  %v364_v14 = vrot.slane %v363_v6, 2 }
 0x19b   :  { %v742_v21 = vmax.f32 %v158_v5, %v159_v13  ;;  %v365_v22 = vmax.f32 %v363_v6, %v364_v14 }
 0x19c   :  { %v147_v25 = vpop.xlane.xlu1 %146 }
 0x19d   :  { %v366_v30 = vrot.slane %v365_v22, 1  ;;  %v172_v31 = vmul.f32 %v171_v62, %v742_v21  ;;  %v167_v32 = vmul.f32 %v166_v63, %v147_v25  ;;  %v187_v34 = vmul.f32 %v186_v3, %v742_v21 }
 0x19e   :  { %v182_v35 = vmul.f32 %v181_v2, %v147_v25  ;;  %v197_v36 = vmul.f32 %v196_v4, %v147_v25  ;;  %v212_v37 = vmul.f32 %v211_v8, %v147_v25  ;;  %v227_v40 = vmul.f32 %v226_v12, %v147_v25 }
 0x19f   :  { %v367_v38 = vmax.f32 %v365_v22, %v366_v30  ;;  %v169_v39 = vadd.f32 %v168_v7, %v167_v32  ;;  %v242_v41 = vmul.f32 %v241_v15, %v147_v25  ;;  %v202_v46 = vmul.f32 %v408_v16, %v742_v21 }
 0x1a0   :  { %v184_v42 = vadd.f32 %v183_v9, %v182_v35  ;;  %v199_v43 = vadd.f32 %v198_v10, %v197_v36  ;;  %v214_v44 = vadd.f32 %v213_v11, %v212_v37  ;;  %v355_v45 = vpop.xlane.xlu1 %354  ;;  %v217_v50 = vmul.f32 %v423_v17, %v742_v21 }
 0x1a1   :  { %v173_v47 = vadd.f32 %v172_v31, %v169_v39  ;;  %v379_v48 = vmul.f32 %v367_v38, %v171_v62  ;;  %v394_v49 = vmul.f32 %v367_v38, %v186_v3  ;;  %v409_v52 = vmul.f32 %v408_v16, %v367_v38 }
 0x1a2   :  { %v188_v51 = vadd.f32 %v187_v34, %v184_v42  ;;  %v374_v53 = vmul.f32 %v355_v45, %v166_v63  ;;  %v389_v54 = vmul.f32 %v355_v45, %v181_v2  ;;  %v404_v56 = vmul.f32 %v355_v45, %v196_v4 }
 0x1a3   :  { %v174_v55 = vmax.f32 %v173_v47, 0.0  ;;  %v419_v57 = vmul.f32 %v355_v45, %v211_v8  ;;  %v434_v58 = vmul.f32 %v355_v45, %v226_v12  ;;  %v424_v59 = vmul.f32 %v423_v17, %v367_v38 }
 0x1a4   :  { %v376_v60 = vadd.f32 %v374_v53, %v168_v7  ;;  %v391_v61 = vadd.f32 %v389_v54, %v183_v9  ;;  %v189_v5 = vmax.f32 %v188_v51, 0.0  ;;  %v406_v6 = vadd.f32 %v404_v56, %v198_v10 }
 0x1a5   :  { %v421_v13 = vadd.f32 %v419_v57, %v213_v11  ;;  %v449_v62 = vmul.f32 %v355_v45, %v241_v15  ;;  %v177_v3 = vmul.f32 %v383_v23, %v174_v55  ;;  %v436_v16 = vadd.f32 %v435_v18, %v434_v58 }
 0x1a6   :  { %v380_v14 = vadd.f32 %v379_v48, %v376_v60  ;;  %v395_v22 = vadd.f32 %v394_v49, %v391_v61  ;;  %v192_v63 = vmul.f32 %v191_v24, %v189_v5  ;;  %v410_v2 = vadd.f32 %v409_v52, %v406_v6 }
 0x1a7   :  { %v425_v4 = vadd.f32 %v424_v59, %v421_v13  ;;  %v178_v7 = vadd.f32 %v177_v3, %v162_v26  ;;  %v203_v8 = vadd.f32 %v202_v46, %v199_v43  ;;  %v218_v11 = vadd.f32 %v217_v50, %v214_v44 }
 0x1a8   :  { %v381_v9 = vmax.f32 %v380_v14, 0.0  ;;  %v396_v10 = vmax.f32 %v395_v22, 0.0  ;;  %v229_v12 = vadd.f32 %v435_v18, %v227_v40  ;;  %v411_v15 = vmax.f32 %v410_v2, 0.0 }
 0x1a9   :  { %v193_v17 = vadd.f32 %v192_v63, %v178_v7  ;;  %v204_v25 = vmax.f32 %v203_v8, 0.0  ;;  %v232_v30 = vmul.f32 %v231_v20, %v742_v21  ;;  %v219_v32 = vmax.f32 %v218_v11, 0.0 }
 0x1aa   :  { %v384_v31 = vmul.f32 %v383_v23, %v381_v9  ;;  %v244_v34 = vadd.f32 %v450_v19, %v242_v41  ;;  %v247_v35 = vmul.f32 %v246_v29, %v742_v21  ;;  %v451_v36 = vadd.f32 %v450_v19, %v449_v62 }
 0x1ab   :  { %v207_v18 = vmul.f32 %v206_v27, %v204_v25  ;;  %v233_v37 = vadd.f32 %v232_v30, %v229_v12  ;;  %v399_v39 = vmul.f32 %v396_v10, %v191_v24  ;;  %v222_v40 = vmul.f32 %v221_v28, %v219_v32 }
 0x1ac   :  { %v248_v42 = vadd.f32 %v247_v35, %v244_v34  ;;  %v385_v23 = vadd.f32 %v384_v31, %v162_v26  ;;  %v426_v43 = vmax.f32 %v425_v4, 0.0  ;;  %v439_v21 = vmul.f32 %v367_v38, %v231_v20 }
 0x1ad   :  { %v208_v41 = vadd.f32 %v207_v18, %v193_v17  ;;  %v234_v44 = vmax.f32 %v233_v37, 0.0  ;;  %v454_v45 = vmul.f32 %v367_v38, %v246_v29  ;;  %v251_v46 = vstv %s757_s28 }
 0x1ae   :  { %v249_v19 = vmax.f32 %v248_v42, 0.0  ;;  %v400_v47 = vadd.f32 %v399_v39, %v385_v23  ;;  %v414_v48 = vmul.f32 %v411_v15, %v206_v27  ;;  %v440_v50 = vadd.f32 %v439_v21, %v436_v16 }
 0x1af   :  { %v223_v24 = vadd.f32 %v222_v40, %v208_v41  ;;  %v237_v49 = vmul.f32 %v236_v33, %v234_v44  ;;  %v455_v51 = vadd.f32 %v454_v45, %v451_v36  ;;  %v429_v26 = vmul.f32 %v426_v43, %v221_v28 }
 0x1b0   :  { %v415_v52 = vadd.f32 %v414_v48, %v400_v47  ;;  %v252_v54 = vmul.f32 %v251_v46, %v249_v19  ;;  %v441_v55 = vmax.f32 %v440_v50, 0.0 }
 0x1b1   :  { %v238_v53 = vadd.f32 %v237_v49, %v223_v24  ;;  %v456_v20 = vmax.f32 %v455_v51, 0.0 }
 0x1b2   :  { %v430_v56 = vadd.f32 %v429_v26, %v415_v52  ;;  %v444_v38 = vmul.f32 %v441_v55, %v236_v33 }
 0x1b3   :  { %v253_v29 = vadd.f32 %v252_v54, %v238_v53  ;;  %v459_v27 = vmul.f32 %v456_v20, %v251_v46 }
 0x1b4   :  { %v445_v58 = vadd.f32 %v444_v38, %v430_v56 }
 0x1b5   :  { %v254_v57 = vmul.f32 %v253_v29, %v650_v0 }
 0x1b6   :  { %v460_v59 = vadd.f32 %v459_v27, %v445_v58 }
 0x1b7   :  { %255 = vst [vmem:[#allocation7] sm:$0xff] %v254_v57 }
 0x1b8   :  { %v461_v60 = vmul.f32 %v460_v59, %v652_v1 }
 0x1ba   :  { %463 = vst [vmem:[#allocation7 + $0x8] sm:$0xff] %v461_v60 }
 0x1bb   :  { %589 = shalt.err (!%p586_p3)
}
 0x1bc   :  { %s590_s5 = scalar_lea.hbm %s812_s3, 256 }
 0x1bd   :  { %p591_p4 = scmp.ne.s32.totalorder %s812_s3, %s590_s5  ;;  %p594_p5 = scmp.lt.u32.totalorder %s590_s5, %s812_s3 }
 0x1bf   :  { %p596_p6 = pnand %p594_p5, %p591_p4 }
 0x1c1   :  { %599 = shalt.err (!%p596_p6)
}
 0x1c2   :  { %475 = dma.vmem_to_hbm [thread:$0]  %s470_s1, 256, %s812_s3, [#allocation4], %s608_s26, %s608_s26, %s609_s27  }
 0x1c3   :  { %604 = dma.done.wait [#allocation4], 256  }
 0x1c4   :  { %605 = vsyncadd [#allocation4], 4294967040 }
 0x1c5   :  { %479 = vsyncpa [#allocation3], 1 }
 0x1c6   :  { %480 = vsyncpa [#allocation4], 1 }
 0x1c7   :  { %481 = vsyncpa [#allocation5], 1 }

</bundles_post_ra>
